<compile_context>
chip_gen: v7x
topology: tpu7x:2x2x1
jax: 0.10.0
libtpu: 0.0.40
codegen_flags: <defaults>
</compile_context>

<pallas_src>
import functools
import math

import jax
import jax.numpy as jnp
from jax.experimental import pallas as pl
from jax.experimental.pallas import tpu as pltpu


def _round_up(x, m):
    return -(-x // m) * m


def _sublane_tile(itemsize):
    # f32 -> 8 sublanes per vreg tile, bf16 -> 16, int8/fp8 -> 32.
    return 8 * max(4 // itemsize, 1)


def _hw_budget():
    """(per-block byte budget, vmem_limit cap) chosen per TPU generation."""
    try:
        vmem_cap = int(pltpu.get_tpu_info().vmem_capacity_bytes)
    except Exception:
        # CPU / interpret mode / older API: assume v7x-sized VMEM (safe cap).
        vmem_cap = 64 << 20
    if vmem_cap >= (96 << 20):
        # v5e / v6e class: 128 MiB VMEM.  Big blocks are nearly free; HBM is
        # slower so per-step overhead matters less.  6 MiB blocks sit on the
        # measured mem-bound roofline plateau.
        return 6 << 20, 96 << 20
    # v7x class: 64 MiB physical VMEM per TensorCore.  ~5 MiB blocks amortize
    # the ~0.35 us/step overhead (~1.9 us of DMA at 3.2 TB/s) while the total
    # footprint (2x in + 2x out double-buffers + f32 temps) stays well under
    # the 64 MiB physical limit.
    return 5 << 20, 44 << 20


def _taylor_softmax_kernel(x_ref, o_ref, *, n):
    # x_ref / o_ref: (tile_l, C, tile_t) block in VMEM; softmax over axis 1 (C).
    x = x_ref[...].astype(jnp.float32)

    if n == 0:
        fn = jnp.ones_like(x)
    else:
        # Horner evaluation with precomputed reciprocal-factorial constants:
        # only VPU multiplies/adds, no vector divides.
        coefs = []
        denor = 1.0
        for i in range(1, n + 1):
            denor *= float(i)
            coefs.append(1.0 / denor)
        fn = jnp.full_like(x, coefs[-1])
        for c in reversed(coefs[:-1]):
            fn = fn * x + c
        fn = fn * x + 1.0

    # Channel reduction over the short sublane axis (XLU; slack slot in this
    # mem-bound kernel) + one exact reciprocal per (row, lane) on the EUP.
    s = jnp.sum(fn, axis=1, keepdims=True)
    inv = pl.reciprocal(s, approx=False)
    o_ref[...] = (fn * inv).astype(o_ref.dtype)


def _choose_tiles(lead, channels, trail, itemsize, budget):
    """Pick (tile_l, tile_t) for blocks of shape (tile_l, C, tile_t)."""
    cp_io = _round_up(channels, _sublane_tile(itemsize))  # sublane-padded C, I/O dtype
    cp_f32 = _round_up(channels, 8)                       # sublane-padded C, f32 temps
    # VMEM bytes per (lead row x lane column):
    #   2x double-buffered input + 2x output blocks at the I/O dtype,
    #   plus ~2 f32-sized temporaries (x cast, fn) for the compute.
    col_bytes = 4 * cp_io * itemsize + 2 * cp_f32 * 4

    # Lane (last-dim) tile: the full dim if a whole row of it fits the budget,
    # otherwise the largest multiple of 128 that fits (ragged last block via
    # pl.cdiv — no requirement that tile_t divides trail).
    if trail * col_bytes <= budget:
        # Note: trail < 128 falls into the masked-store (vst.msk) regime; this
        # is an accepted cost for small-spatial NCHW inputs.
        tile_t = trail
    else:
        tile_t = max(((budget // col_bytes) // 128) * 128, 128)
    tp = _round_up(tile_t, 128)  # lane-padded VMEM footprint

    # Leading tile: as many rows as fit the budget (any value; ragged last
    # block is fine, no divisor / power-of-two restriction).
    tile_l = max(min(lead, budget // (tp * col_bytes)), 1)

    # Keep enough grid steps that the double-buffered pipeline overlaps DMA
    # with compute and both v7x TensorCores get >= 4 steps each, but never
    # shrink blocks below ~512 KiB (tiny blocks pay more in per-step overhead
    # than pipelining recovers).
    target_steps = 8
    min_block = 512 << 10

    def steps(tl, tt):
        return pl.cdiv(lead, tl) * pl.cdiv(trail, tt)

    while steps(tile_l, tile_t) < target_steps:
        if tile_l > 1 and max(tile_l // 2, 1) * tp * col_bytes >= min_block:
            tile_l = max(tile_l // 2, 1)
            continue
        new_t = ((tile_t // 2) // 128) * 128
        if new_t >= 128 and tile_l * new_t * col_bytes >= min_block:
            tile_t = new_t
            tp = _round_up(tile_t, 128)
            continue
        break

    return tile_l, tile_t


def _taylor_softmax_3d(x3, n):
    L, C, T = x3.shape
    itemsize = jnp.dtype(x3.dtype).itemsize
    budget, vmem_cap = _hw_budget()
    tile_l, tile_t = _choose_tiles(L, C, T, itemsize, budget)

    grid_l = pl.cdiv(L, tile_l)
    grid_t = pl.cdiv(T, tile_t)

    # Put the grid axis with more steps first so the megacore split (v7x,
    # 2 TensorCores) lands on it.  Both axes are fully parallel.
    if grid_l >= grid_t:
        grid = (grid_l, grid_t)
        index_map = lambda i, j: (i, 0, j)
    else:
        grid = (grid_t, grid_l)
        index_map = lambda i, j: (j, 0, i)

    # VMEM limit estimate with sublane/lane padding included.
    # Note: C is never blocked (single-pass channel reduction), so extremely
    # large softmax dims could exceed VMEM; typical channel counts are small.
    cp_io = _round_up(C, _sublane_tile(itemsize))
    cp_f32 = _round_up(C, 8)
    tp = _round_up(tile_t, 128)
    io_bytes = 4 * tile_l * cp_io * tp * itemsize   # 2x in + 2x out, double-buffered
    tmp_bytes = 2 * tile_l * cp_f32 * tp * 4        # f32 compute temporaries
    vmem_limit = int(min(max(2 * (io_bytes + tmp_bytes) + (8 << 20), 32 << 20),
                         vmem_cap))

    spec = pl.BlockSpec((tile_l, C, tile_t), index_map)
    return pl.pallas_call(
        functools.partial(_taylor_softmax_kernel, n=n),
        out_shape=jax.ShapeDtypeStruct((L, C, T), x3.dtype),
        grid_spec=pltpu.PrefetchScalarGridSpec(
            num_scalar_prefetch=0,
            grid=grid,
            in_specs=[spec],
            out_specs=spec,
        ),
        compiler_params=pltpu.CompilerParams(
            dimension_semantics=("parallel", "parallel"),
            vmem_limit_bytes=vmem_limit,
        ),
    )(x3)


def taylor_softmax(x, dim=1, n=2):
    """TaylorSoftmax forward. Softmax over `dim`; reshape only, no transposes."""
    assert n % 2 == 0
    dim = dim % x.ndim
    lead = int(math.prod(x.shape[:dim]))
    C = int(x.shape[dim])
    trail = int(math.prod(x.shape[dim + 1:]))
    x3 = x.reshape(lead, C, trail)
    out3 = _taylor_softmax_3d(x3, n)
    return out3.reshape(x.shape)


def _taylor_softmax_ref(x, dim=1, n=2):
    fn = jnp.ones_like(x)
    denor = 1.0
    for i in range(1, n + 1):
        denor *= i
        fn = fn + jnp.power(x, i) / denor
    return fn / jnp.sum(fn, axis=dim, keepdims=True)


if __name__ == "__main__":
    key = jax.random.PRNGKey(0)
    # NCHW input, softmax over channel dim=1 (matches module defaults dim=1, n=2).
    x = jax.random.normal(key, (2, 4, 16, 16), dtype=jnp.float32)

    out = taylor_softmax(x, dim=1, n=2)
    out = jax.block_until_ready(out)

    ref = _taylor_softmax_ref(x, dim=1, n=2)
    assert out.shape == x.shape and out.dtype == x.dtype
    assert jnp.allclose(out, ref, atol=1e-5, rtol=1e-5)

    print("KERNEL_OK")
</pallas_src>

<mosaic_0001>
module attributes {stable_mosaic.version = 11 : i64} {
  func.func @_taylor_softmax_kernel(%arg0: i32, %arg1: i32, %arg2: memref<2x4x256xf32, #tpu.memory_space<vmem>>, %arg3: memref<2x4x256xf32, #tpu.memory_space<vmem>>) attributes {dimension_semantics = [#tpu.dimension_semantics<parallel>, #tpu.dimension_semantics<parallel>], iteration_bounds = array<i64: 1, 1>, scalar_prefetch = 0 : i64, scratch_operands = 0 : i64, tpu.core_type = #tpu.core_type<tc>, window_params = [{transform_indices = @transform_0, window_bounds = array<i64: 2, 4, 256>}, {transform_indices = @transform_1, window_bounds = array<i64: 2, 4, 256>}]} {
    %c0 = arith.constant 0 : index
    %c0_0 = arith.constant 0 : index
    %c0_1 = arith.constant 0 : index
    %0 = vector.load %arg2[%c0, %c0_0, %c0_1] : memref<2x4x256xf32, #tpu.memory_space<vmem>>, vector<2x4x256xf32>
    %cst = arith.constant 5.000000e-01 : f32
    %1 = vector.broadcast %cst : f32 to vector<2x4x256xf32>
    %2 = arith.mulf %1, %0 : vector<2x4x256xf32>
    %cst_2 = arith.constant 1.000000e+00 : f32
    %3 = vector.broadcast %cst_2 : f32 to vector<2x4x256xf32>
    %4 = arith.addf %2, %3 : vector<2x4x256xf32>
    %5 = arith.mulf %4, %0 : vector<2x4x256xf32>
    %cst_3 = arith.constant 1.000000e+00 : f32
    %6 = vector.broadcast %cst_3 : f32 to vector<2x4x256xf32>
    %7 = arith.addf %5, %6 : vector<2x4x256xf32>
    %cst_4 = arith.constant dense<0.000000e+00> : vector<2x256xf32>
    %8 = vector.multi_reduction <add>, %7, %cst_4 [1] : vector<2x4x256xf32> to vector<2x256xf32>
    %9 = vector.shape_cast %8 : vector<2x256xf32> to vector<2x1x256xf32>
    %10 = tpu.reciprocal %9 : vector<2x1x256xf32> -> vector<2x1x256xf32>
    %11 = vector.broadcast %10 : vector<2x1x256xf32> to vector<2x4x256xf32>
    %12 = arith.mulf %7, %11 : vector<2x4x256xf32>
    %c0_5 = arith.constant 0 : index
    %c0_6 = arith.constant 0 : index
    %c0_7 = arith.constant 0 : index
    %13 = vector.load %arg3[%c0_5, %c0_6, %c0_7] : memref<2x4x256xf32, #tpu.memory_space<vmem>>, vector<2x4x256xf32>
    tpu.vector_store %arg3[%c0_5, %c0_6, %c0_7], %12 {strides = array<i32>} : memref<2x4x256xf32, #tpu.memory_space<vmem>>, vector<2x4x256xf32>,
    return
  }
  func.func @transform_0(%arg0: i32, %arg1: i32) -> (i32, i32, i32) {
    %c0_i32 = arith.constant 0 : i32
    %c0_i32_0 = arith.constant 0 : i32
    return %arg0, %c0_i32, %arg1 : i32, i32, i32
  }
  func.func @transform_1(%arg0: i32, %arg1: i32) -> (i32, i32, i32) {
    %c0_i32 = arith.constant 0 : i32
    %c0_i32_0 = arith.constant 0 : i32
    return %arg0, %c0_i32, %arg1 : i32, i32, i32
  }
}

</mosaic_0001>

<bundles_post_ra>
// kernel: tpu_custom_call.1
= control target key start
LH: loop header
LB: loop body
LE: loop exit
PB: predicated region body
PF: predicated region fallthrough
CT: control target
= control target key end

     0   :  { %6 = vsyncpa [#allocation3], 0  ;;  %s205_s0 = inlined_call_operand.hbm [shape: f32[2,4,256], index: 0, kind: input, shape index: {}]   ;;  %s206_s1 = inlined_call_operand.hbm [shape: f32[2,4,256], index: 1, kind: output, shape index: {}]  }
   0x1   :  { %7 = vsyncpa [#allocation4], 0  ;;  %s161_s6 = smov [#allocation2]   ;;  %s113_s10 = scalar_lea.hbm %s205_s0, 256 }
   0x2   :  { %s13_s7 = sshll.u32 %s161_s6, 4  ;;  %p114_p0 = scmp.ne.s32.totalorder %s205_s0, %s113_s10  ;;  %s14_s7 = int_to_ptr.vmem [resolvable:$true] %s13_s7 }
   0x3   :  { %p117_p1 = scmp.lt.u32.totalorder %s113_s10, %s205_s0 }
   0x5   :  { %p119_p2 = pnand %p117_p1, %p114_p0 }
   0x7   :  { %122 = shalt.err (!%p119_p2)
}
   0x8   :  { %s123_s15 = scalar_lea.vmem %s14_s7, 256  ;;  %p128_p4 = scmp.lt.s32.totalorder %s14_s7, %s14_s7 }
   0x9   :  { %p124_p3 = scmp.ne.s32.totalorder %s14_s7, %s123_s15  ;;  %p129_p5 = scmp.lt.s32.totalorder %s123_s15, %s123_s15 }
   0xb   :  { %p130_p6 = por %p129_p5, %p128_p4 }
   0xd   :  { %p131_p7 = pnand %p130_p6, %p124_p3 }
   0xf   :  { %134 = shalt.err (!%p131_p7)
}
  0x10   :  { %s162_s16 = smov 128   ;;  %s163_s17 = smov 8  }
  0x11   :  { %19 = dma.hbm_to_vmem [thread:$0]  %s205_s0, 256, %s14_s7, [#allocation3], %s162_s16, %s162_s16, %s163_s17  }
  0x12   :  { %157 = dma.done.wait [#allocation3], 256  }
  0x13   :  { %158 = vsyncadd [#allocation3], 4294967040  ;;  %v23_v0 = vld [vmem:[#allocation2] sm:$0xff]  ;;  %v24_v1 = vld [vmem:[#allocation2 + $0x8] sm:$0xff]  ;;  %vm39_vm0 = vcmask 1043456   ;;  %s164_s0 = smov [#allocation5]  }
  0x14   :  { %v25_v2 = vmul.f32 0.5, %v23_v0  ;;  %v26_v3 = vmul.f32 0.5, %v24_v1  ;;  %s89_s20 = sshll.u32 %s164_s0, 4  ;;  %s90_s20 = int_to_ptr.vmem [resolvable:$true] %s89_s20 }
  0x15   :  { %s135_s21 = scalar_lea.vmem %s90_s20, 256  ;;  %p140_p9 = scmp.lt.s32.totalorder %s90_s20, %s90_s20 }
  0x16   :  { %v27_v4 = vadd.f32 1.0, %v25_v2  ;;  %v28_v5 = vadd.f32 1.0, %v26_v3  ;;  %p136_p8 = scmp.ne.s32.totalorder %s90_s20, %s135_s21  ;;  %p141_p10 = scmp.lt.s32.totalorder %s135_s21, %s135_s21 }
  0x18   :  { %v29_v6 = vmul.f32 %v27_v4, %v23_v0  ;;  %v30_v7 = vmul.f32 %v28_v5, %v24_v1  ;;  %p142_p11 = por %p141_p10, %p140_p9 }
  0x1a   :  { %v31_v8 = vadd.f32 1.0, %v29_v6  ;;  %v32_v9 = vadd.f32 1.0, %v30_v7  ;;  %p143_p12 = pnand %p142_p11, %p136_p8 }
  0x1c   :  { %v35_v10 = vcombine.high %v31_v8, %v31_v8  ;;  %v40_v11 = vsel %vm39_vm0, %v31_v8, 0.0  ;;  %v36_v12 = vcombine.high %v32_v9, %v32_v9  ;;  %v54_v13 = vsel %vm39_vm0, %v32_v9, 0.0 }
  0x1d   :  { %v41_v14 = vrot.slane %v40_v11, 4  ;;  %v55_v15 = vrot.slane %v54_v13, 4 }
  0x1e   :  { %v47_v16 = vsel %vm39_vm0, %v35_v10, 0.0  ;;  %v61_v17 = vsel %vm39_vm0, %v36_v12, 0.0 }
  0x1f   :  { %v42_v18 = vadd.f32 %v41_v14, %v40_v11  ;;  %v48_v19 = vrot.slane %v47_v16, 4  ;;  %v56_v20 = vadd.f32 %v55_v15, %v54_v13  ;;  %v62_v21 = vrot.slane %v61_v17, 4 }
  0x21   :  { %v43_v22 = vrot.slane %v42_v18, 2  ;;  %v49_v23 = vadd.f32 %v48_v19, %v47_v16  ;;  %v57_v24 = vrot.slane %v56_v20, 2  ;;  %v63_v25 = vadd.f32 %v62_v21, %v61_v17 }
  0x23   :  { %v44_v26 = vadd.f32 %v43_v22, %v42_v18  ;;  %v50_v27 = vrot.slane %v49_v23, 2  ;;  %v58_v28 = vadd.f32 %v57_v24, %v56_v20  ;;  %v64_v29 = vrot.slane %v63_v25, 2 }
  0x25   :  { %v45_v30 = vrot.slane %v44_v26, 1  ;;  %v51_v31 = vadd.f32 %v50_v27, %v49_v23  ;;  %v59_v32 = vrot.slane %v58_v28, 1  ;;  %v65_v33 = vadd.f32 %v64_v29, %v63_v25 }
  0x27   :  { %v46_v34 = vadd.f32 %v45_v30, %v44_v26  ;;  %v52_v35 = vrot.slane %v51_v31, 1  ;;  %v60_v36 = vadd.f32 %v59_v32, %v58_v28  ;;  %v66_v37 = vrot.slane %v65_v33, 1 }
  0x29   :  { %v53_v38 = vadd.f32 %v52_v35, %v51_v31  ;;  %105 = vrcp.f32 %v46_v34  ;;  %v67_v39 = vadd.f32 %v66_v37, %v65_v33 }
  0x2a   :  { %107 = vrcp.f32 %v60_v36 }
  0x2b   :  { %109 = vrcp.f32 %v53_v38 }
  0x2c   :  { %111 = vrcp.f32 %v67_v39 }
  0x33   :  { %v106_v40 = vpop.eup %105 }
  0x34   :  { %v108_v41 = vpop.eup %107 }
  0x35   :  { %v110_v42 = vpop.eup %109 }
  0x36   :  { %v112_v43 = vpop.eup %111  ;;  %v76_v44 = vcombine.low %v106_v40, %v110_v42 }
  0x37   :  { %v77_v45 = vcombine.low %v108_v41, %v112_v43 }
  0x38   :  { %v80_v46 = vmul.f32 %v76_v44, %v31_v8 }
  0x39   :  { %v81_v47 = vmul.f32 %v77_v45, %v32_v9 }
  0x3a   :  { %82 = vst [vmem:[#allocation5] sm:$0xff] %v80_v46 }
  0x3b   :  { %83 = vst [vmem:[#allocation5 + $0x8] sm:$0xff] %v81_v47 }
  0x3c   :  { %146 = shalt.err (!%p143_p12)
}
  0x3d   :  { %s147_s24 = scalar_lea.hbm %s206_s1, 256 }
  0x3e   :  { %p148_p13 = scmp.ne.s32.totalorder %s206_s1, %s147_s24  ;;  %p151_p0 = scmp.lt.u32.totalorder %s147_s24, %s206_s1 }
  0x40   :  { %p153_p1 = pnand %p151_p0, %p148_p13 }
  0x42   :  { %156 = shalt.err (!%p153_p1)
}
  0x43   :  { %95 = dma.vmem_to_hbm [thread:$0]  %s90_s20, 256, %s206_s1, [#allocation4], %s162_s16, %s162_s16, %s163_s17  }
  0x44   :  { %159 = dma.done.wait [#allocation4], 256  }
  0x45   :  { %160 = vsyncadd [#allocation4], 4294967040 }
  0x46   :  { %99 = vsyncpa [#allocation3], 1 }
  0x47   :  { %100 = vsyncpa [#allocation4], 1 }

</bundles_post_ra>
